<compile_context>
chip_gen: v7x
topology: tpu7x:2x2x1
jax: 0.10.0
libtpu: 0.0.40
codegen_flags: <defaults>
</compile_context>

<pallas_src>
from functools import partial

import jax
import jax.numpy as jnp
from jax.experimental import pallas as pl
from jax.experimental.pallas import tpu as pltpu


_MAX_ROW_TILE = 1024  # batch-lane tile (multiple of 128); VMEM allows 2048 too


# ---------------------------------------------------------------------------
# Fused Pallas kernel: expander-folded layer 0 + T-batched MLP tail
# ---------------------------------------------------------------------------
def _make_fused_kernel(num_tail_layers, decoder_length, h0):
    """Ref order: (static_T, dyn_T, wf, bf, w0_dyn, [w_i, b_i]*num_tail, out)."""

    def kernel(static_ref, dyn_ref, wf_ref, bf_ref, w0d_ref, *rest):
        out_ref = rest[-1]
        tail = rest[:-1]
        nb = static_ref.shape[1]          # row-tile (lane) width, multiple of 128
        t_steps = decoder_length

        # ---- Layer 0, static half: fused expander for ALL time steps in ONE
        #      MXU matmul  (T*H0, F) @ (F, nb) -> (T*H0, nb), f32 accumulation.
        sc = jnp.dot(wf_ref[...], static_ref[...],
                     preferred_element_type=jnp.float32) + bf_ref[...]

        # ---- Re-layout onto a single merged lane axis (t-major columns).
        #      Every concat offset is a multiple of nb (>=128), so these are
        #      aligned whole-tile VMEM copies (no masked/shifted lanes).
        h_stat = jnp.concatenate(
            [sc[tt * h0:(tt + 1) * h0, :] for tt in range(t_steps)], axis=1)  # (H0, T*nb)
        dyn_all = jnp.concatenate(
            [dyn_ref[tt] for tt in range(t_steps)], axis=1)                   # (C_dyn, T*nb)

        # ---- Layer 0, dynamic half: ONE (H0, C_dyn) @ (C_dyn, T*nb) matmul.
        h = h_stat + jnp.dot(w0d_ref[...], dyn_all,
                             preferred_element_type=jnp.float32)
        h = jnp.maximum(h, 0.0)                                   # ReLU

        # ---- Tail layers: ONE weight-stationary matmul per layer over the
        #      full T*nb lane axis; weights/biases loaded once (hoisted).
        for i in range(num_tail_layers):
            w = tail[2 * i][...]                                  # (H_i, H_{i-1})
            b = tail[2 * i + 1][...]                              # (H_i, 1) f32
            h = jnp.dot(w, h.astype(w.dtype),
                        preferred_element_type=jnp.float32) + b
            h = jnp.maximum(h, 0.0)                               # ReLU

        # ---- Lane-dense stores: aligned lane slices of the merged axis.
        h = h.astype(out_ref.dtype)
        for tt in range(t_steps):
            out_ref[tt, :, :] = h[:, tt * nb:(tt + 1) * nb]

    return kernel


# ---------------------------------------------------------------------------
# Parameter preparation: fold expander into MLP layer 0, transpose weights
# ---------------------------------------------------------------------------
def prepare_fused_params(params, compute_dtype=jnp.bfloat16):
    """Fold the expander into MLP layer 0; weights become (C_out, C_in).

    NOTE: with bf16 the folded weights are computed in f32 then cast, and the
    wrapper casts the inputs to bf16 before the kernel; numerics differ
    slightly from a pure-f32 PyTorch reference (covered by a loose tolerance).
    """
    t = params["decoder_length"]
    s = params["static_outputs_per_time_step"]
    ew = params["expander_w"].astype(jnp.float32)       # (F, T*S)
    eb = params["expander_b"].astype(jnp.float32)       # (T*S,)
    mlp = [(w.astype(jnp.float32), b.astype(jnp.float32)) for w, b in params["mlp"]]
    (w0, b0), tail = mlp[0], mlp[1:]
    f = ew.shape[0]
    h0 = w0.shape[1]
    n_dyn = w0.shape[0] - s            # derived from the params, not hardcoded
    assert n_dyn > 0, "MLP layer-0 input smaller than static_outputs_per_time_step"

    w0_dyn = w0[:n_dyn]                # (C_dyn, H0)
    w0_stat = w0[n_dyn:n_dyn + s]      # (S, H0)

    # Fold (in f32): wf[t, h, f] = sum_s ew[f, t*S+s] * w0_stat[s, h]
    ew_r = ew.reshape(f, t, s)
    wf = jnp.einsum("fts,sh->thf", ew_r, w0_stat)        # (T, H0, F)
    bf = eb.reshape(t, s) @ w0_stat + b0[None, :]        # (T, H0)

    return {
        "T": t,
        "H0": h0,
        "H_last": (tail[-1][0].shape[1] if tail else h0),
        "num_dynamic_features": n_dyn,
        "dtype": compute_dtype,
        "wf": wf.reshape(t * h0, f).astype(compute_dtype),   # (T*H0, F)
        "bf": bf.reshape(t * h0, 1).astype(jnp.float32),     # (T*H0, 1)  f32 bias
        "w0_dyn": w0_dyn.T.astype(compute_dtype),            # (H0, C_dyn)
        "tail": [(w.T.astype(compute_dtype),                 # (H_i, H_{i-1})
                  b.reshape(-1, 1).astype(jnp.float32))      # (H_i, 1)
                 for w, b in tail],
    }


# ---------------------------------------------------------------------------
# Row-tile selection: balanced, 128-aligned, >=2 grid steps when N > 128
# ---------------------------------------------------------------------------
def _round_up(x, m):
    return ((x + m - 1) // m) * m


def _pick_row_tile(n):
    n_blocks = max(pl.cdiv(n, _MAX_ROW_TILE), 2 if n > 128 else 1)
    return min(_round_up(pl.cdiv(n, n_blocks), 128), _MAX_ROW_TILE)


# ---------------------------------------------------------------------------
# Forward pass (single pallas_call; wrapper only does layout plumbing)
# ---------------------------------------------------------------------------
def one_shot_decoder_forward(fused, static_input, dynamic_input, *,
                             transpose_output=True):
    """
    static_input : (N, input_size)
    dynamic_input: (N, T, C_dyn)
    returns      : (N, T, layer_sizes[-1])                  if transpose_output
                   (T, layer_sizes[-1], N) lane-dense slab  otherwise (skips one
                   full HBM read+write pass over the output).
    """
    n = static_input.shape[0]
    t = fused["T"]
    h_last = fused["H_last"]
    n_dyn = fused["num_dynamic_features"]
    dtype = fused["dtype"]
    assert dynamic_input.shape[1:] == (t, n_dyn), dynamic_input.shape

    # Rows-on-lanes layout (these transposes only touch the small inputs).
    static_t = static_input.T.astype(dtype)                        # (F, N)
    dyn_t = jnp.transpose(dynamic_input, (1, 2, 0)).astype(dtype)  # (T, C_dyn, N)

    # Pad tiny batches up to one 128-lane tile so every in-kernel lane
    # concat/slice stays 128-aligned.  For N >= 128 Pallas masks the partial
    # trailing block itself; garbage lanes never mix across columns because
    # every op in the kernel is column-independent.
    if n < 128:
        pad = 128 - n
        static_t = jnp.pad(static_t, ((0, 0), (0, pad)))
        dyn_t = jnp.pad(dyn_t, ((0, 0), (0, 0), (0, pad)))
        n_eff = 128
    else:
        n_eff = n

    nb = _pick_row_tile(n_eff)
    grid = (pl.cdiv(n_eff, nb),)

    weights = [fused["wf"], fused["bf"], fused["w0_dyn"]]
    for w, b in fused["tail"]:
        weights += [w, b]

    def resident(a):
        # Full-array block + constant index map: Pallas sees the same block
        # index every grid step and skips the re-DMA -> weights stay resident.
        nd = a.ndim
        return pl.BlockSpec(a.shape, lambda r, _nd=nd: (0,) * _nd)

    out_t = pl.pallas_call(
        _make_fused_kernel(len(fused["tail"]), t, fused["H0"]),
        out_shape=jax.ShapeDtypeStruct((t, h_last, n_eff), dtype),
        grid=grid,
        in_specs=[
            pl.BlockSpec((static_t.shape[0], nb), lambda r: (0, r)),
            pl.BlockSpec((t, n_dyn, nb), lambda r: (0, 0, r)),
        ] + [resident(a) for a in weights],
        out_specs=pl.BlockSpec((t, h_last, nb), lambda r: (0, 0, r)),
        compiler_params=pltpu.CompilerParams(
            dimension_semantics=("parallel",)),   # v7x: shard rows over 2 TCs
    )(static_t, dyn_t, *weights)

    if transpose_output:
        # Module layout (N, T, H_last): costs one extra HBM pass of the output.
        return jnp.transpose(out_t, (2, 0, 1))[:n]
    return out_t[:, :, :n]                         # lane-dense fast path


# ---------------------------------------------------------------------------
# Deterministic parameter init (matches nn.Linear shapes)
# ---------------------------------------------------------------------------
def init_params(key, input_size, decoder_length, layer_sizes, static_outputs_per_time_step):
    keys = jax.random.split(key, 2 + 2 * len(layer_sizes))
    expander_out = decoder_length * static_outputs_per_time_step
    scale_e = 1.0 / jnp.sqrt(input_size)
    expander_w = jax.random.uniform(
        keys[0], (input_size, expander_out), jnp.float32, -scale_e, scale_e)
    expander_b = jax.random.uniform(
        keys[1], (expander_out,), jnp.float32, -scale_e, scale_e)

    mlp_in = 4 + static_outputs_per_time_step
    mlp = []
    in_dim = mlp_in
    for i, out_dim in enumerate(layer_sizes):
        sc = 1.0 / jnp.sqrt(in_dim)
        w = jax.random.uniform(keys[2 + 2 * i], (in_dim, out_dim), jnp.float32, -sc, sc)
        b = jax.random.uniform(keys[3 + 2 * i], (out_dim,), jnp.float32, -sc, sc)
        mlp.append((w, b))
        in_dim = out_dim

    return {
        "expander_w": expander_w,
        "expander_b": expander_b,
        "mlp": mlp,
        "decoder_length": decoder_length,
        "static_outputs_per_time_step": static_outputs_per_time_step,
    }


# ---------------------------------------------------------------------------
# Pure-JAX reference (un-fused, f32) for correctness checking
# ---------------------------------------------------------------------------
def reference_forward(params, static_input, dynamic_input):
    n = static_input.shape[0]
    t = params["decoder_length"]
    s = params["static_outputs_per_time_step"]
    e = static_input @ params["expander_w"] + params["expander_b"]
    static_tile = e.reshape(n, t, s)
    h = jnp.concatenate([dynamic_input, static_tile], axis=2)
    for w, b in params["mlp"]:
        h = jnp.maximum(h @ w + b, 0.0)
    return h


if __name__ == "__main__":
    # Small, module-consistent shapes.
    batch = 2
    input_size = 8                     # static feature dim fed to the expander
    decoder_length = 8                 # T
    static_outputs_per_time_step = 4   # S
    layer_sizes = [32, 16]             # MLP hidden layer sizes
    dyn_features = 4                   # MLP input = 4 + S -> dynamic channels = 4

    key = jax.random.PRNGKey(0)
    k_params, k_static, k_dyn = jax.random.split(key, 3)

    params = init_params(k_params, input_size, decoder_length, layer_sizes,
                         static_outputs_per_time_step)
    static_input = jax.random.normal(k_static, (batch, input_size), jnp.float32)
    dynamic_input = jax.random.normal(
        k_dyn, (batch, decoder_length, dyn_features), jnp.float32)

    ref = reference_forward(params, static_input, dynamic_input)

    # f32 path: strict check (tolerance covers the exact->folded reassociation).
    fused_f32 = prepare_fused_params(params, jnp.float32)
    fwd_f32 = jax.jit(partial(one_shot_decoder_forward, fused_f32))
    out_f32 = jax.block_until_ready(fwd_f32(static_input, dynamic_input))
    assert out_f32.shape == (batch, decoder_length, layer_sizes[-1]), out_f32.shape
    assert jnp.allclose(out_f32, ref, atol=1e-4, rtol=1e-4), "f32 mismatch vs reference"

    # Default bf16 streaming path (v6e/v7x; halves HBM bytes): loose check.
    fused_bf16 = prepare_fused_params(params)           # compute_dtype=bf16 default
    fwd_bf16 = jax.jit(partial(one_shot_decoder_forward, fused_bf16))
    out_bf16 = jax.block_until_ready(fwd_bf16(static_input, dynamic_input))
    assert out_bf16.shape == (batch, decoder_length, layer_sizes[-1]), out_bf16.shape
    assert jnp.allclose(out_bf16.astype(jnp.float32), ref, atol=1e-1, rtol=1e-1), \
        "bf16 mismatch vs reference"

    # Lane-dense (T, H_last, N) fast path: skips the output-transpose HBM pass.
    fwd_fast = jax.jit(partial(one_shot_decoder_forward, fused_bf16,
                               transpose_output=False))
    out_fast = jax.block_until_ready(fwd_fast(static_input, dynamic_input))
    assert out_fast.shape == (decoder_length, layer_sizes[-1], batch), out_fast.shape
    assert jnp.allclose(jnp.transpose(out_fast, (2, 0, 1)).astype(jnp.float32),
                        out_bf16.astype(jnp.float32), atol=1e-6, rtol=1e-6), \
        "fast-path layout mismatch"

    print("KERNEL_OK")
</pallas_src>

<mosaic_0001>
module attributes {stable_mosaic.version = 11 : i64} {
  func.func @kernel(%arg0: i32, %arg1: memref<8x128xf32, #tpu.memory_space<vmem>>, %arg2: memref<8x4x128xf32, #tpu.memory_space<vmem>>, %arg3: memref<256x8xf32, #tpu.memory_space<vmem>>, %arg4: memref<256x1xf32, #tpu.memory_space<vmem>>, %arg5: memref<32x4xf32, #tpu.memory_space<vmem>>, %arg6: memref<16x32xf32, #tpu.memory_space<vmem>>, %arg7: memref<16x1xf32, #tpu.memory_space<vmem>>, %arg8: memref<8x16x128xf32, #tpu.memory_space<vmem>>) attributes {dimension_semantics = [#tpu.dimension_semantics<parallel>], iteration_bounds = array<i64: 1>, scalar_prefetch = 0 : i64, scratch_operands = 0 : i64, tpu.core_type = #tpu.core_type<tc>, window_params = [{transform_indices = @transform_0, window_bounds = array<i64: 8, 128>}, {transform_indices = @transform_1, window_bounds = array<i64: 8, 4, 128>}, {pipeline_mode = #tpu.pipeline_mode<synchronous>, transform_indices = @transform_2, window_bounds = array<i64: 256, 8>}, {pipeline_mode = #tpu.pipeline_mode<synchronous>, transform_indices = @transform_3, window_bounds = array<i64: 256, 1>}, {pipeline_mode = #tpu.pipeline_mode<synchronous>, transform_indices = @transform_4, window_bounds = array<i64: 32, 4>}, {pipeline_mode = #tpu.pipeline_mode<synchronous>, transform_indices = @transform_5, window_bounds = array<i64: 16, 32>}, {pipeline_mode = #tpu.pipeline_mode<synchronous>, transform_indices = @transform_6, window_bounds = array<i64: 16, 1>}, {transform_indices = @transform_7, window_bounds = array<i64: 8, 16, 128>}]} {
    %c0 = arith.constant 0 : index
    %c0_0 = arith.constant 0 : index
    %0 = vector.load %arg3[%c0, %c0_0] : memref<256x8xf32, #tpu.memory_space<vmem>>, vector<256x8xf32>
    %c0_1 = arith.constant 0 : index
    %c0_2 = arith.constant 0 : index
    %1 = vector.load %arg1[%c0_1, %c0_2] : memref<8x128xf32, #tpu.memory_space<vmem>>, vector<8x128xf32>
    %cst = arith.constant dense<0.000000e+00> : vector<256x128xf32>
    %2 = tpu.matmul %0, %1, %cst {dimension_numbers = #tpu.dot_dimension_numbers<[1], [0], [0], [1], [0, 0, 1, 1], [], []>} : vector<256x8xf32>, vector<8x128xf32>, vector<256x128xf32> -> vector<256x128xf32>
    %c0_3 = arith.constant 0 : index
    %c0_4 = arith.constant 0 : index
    %3 = vector.load %arg4[%c0_3, %c0_4] : memref<256x1xf32, #tpu.memory_space<vmem>>, vector<256x1xf32>
    %4 = vector.broadcast %3 : vector<256x1xf32> to vector<256x128xf32>
    %5 = arith.addf %2, %4 : vector<256x128xf32>
    %6 = vector.extract_strided_slice %5 {offsets = [0, 0], sizes = [32, 128], strides = [1, 1]} : vector<256x128xf32> to vector<32x128xf32>
    %7 = vector.extract_strided_slice %5 {offsets = [32, 0], sizes = [32, 128], strides = [1, 1]} : vector<256x128xf32> to vector<32x128xf32>
    %8 = vector.extract_strided_slice %5 {offsets = [64, 0], sizes = [32, 128], strides = [1, 1]} : vector<256x128xf32> to vector<32x128xf32>
    %9 = vector.extract_strided_slice %5 {offsets = [96, 0], sizes = [32, 128], strides = [1, 1]} : vector<256x128xf32> to vector<32x128xf32>
    %10 = vector.extract_strided_slice %5 {offsets = [128, 0], sizes = [32, 128], strides = [1, 1]} : vector<256x128xf32> to vector<32x128xf32>
    %11 = vector.extract_strided_slice %5 {offsets = [160, 0], sizes = [32, 128], strides = [1, 1]} : vector<256x128xf32> to vector<32x128xf32>
    %12 = vector.extract_strided_slice %5 {offsets = [192, 0], sizes = [32, 128], strides = [1, 1]} : vector<256x128xf32> to vector<32x128xf32>
    %13 = vector.extract_strided_slice %5 {offsets = [224, 0], sizes = [32, 128], strides = [1, 1]} : vector<256x128xf32> to vector<32x128xf32>
    %14 = tpu.concatenate %6, %7, %8, %9, %10, %11, %12, %13 in 1 : vector<32x128xf32>, vector<32x128xf32>, vector<32x128xf32>, vector<32x128xf32>, vector<32x128xf32>, vector<32x128xf32>, vector<32x128xf32>, vector<32x128xf32> -> vector<32x1024xf32>
    %c0_5 = arith.constant 0 : index
    %c0_6 = arith.constant 0 : index
    %c0_7 = arith.constant 0 : index
    %15 = vector.load %arg2[%c0_5, %c0_6, %c0_7] : memref<8x4x128xf32, #tpu.memory_space<vmem>>, vector<1x4x128xf32>
    %16 = vector.shape_cast %15 : vector<1x4x128xf32> to vector<4x128xf32>
    %c1 = arith.constant 1 : index
    %c0_8 = arith.constant 0 : index
    %c0_9 = arith.constant 0 : index
    %17 = vector.load %arg2[%c1, %c0_8, %c0_9] : memref<8x4x128xf32, #tpu.memory_space<vmem>>, vector<1x4x128xf32>
    %18 = vector.shape_cast %17 : vector<1x4x128xf32> to vector<4x128xf32>
    %c2 = arith.constant 2 : index
    %c0_10 = arith.constant 0 : index
    %c0_11 = arith.constant 0 : index
    %19 = vector.load %arg2[%c2, %c0_10, %c0_11] : memref<8x4x128xf32, #tpu.memory_space<vmem>>, vector<1x4x128xf32>
    %20 = vector.shape_cast %19 : vector<1x4x128xf32> to vector<4x128xf32>
    %c3 = arith.constant 3 : index
    %c0_12 = arith.constant 0 : index
    %c0_13 = arith.constant 0 : index
    %21 = vector.load %arg2[%c3, %c0_12, %c0_13] : memref<8x4x128xf32, #tpu.memory_space<vmem>>, vector<1x4x128xf32>
    %22 = vector.shape_cast %21 : vector<1x4x128xf32> to vector<4x128xf32>
    %c4 = arith.constant 4 : index
    %c0_14 = arith.constant 0 : index
    %c0_15 = arith.constant 0 : index
    %23 = vector.load %arg2[%c4, %c0_14, %c0_15] : memref<8x4x128xf32, #tpu.memory_space<vmem>>, vector<1x4x128xf32>
    %24 = vector.shape_cast %23 : vector<1x4x128xf32> to vector<4x128xf32>
    %c5 = arith.constant 5 : index
    %c0_16 = arith.constant 0 : index
    %c0_17 = arith.constant 0 : index
    %25 = vector.load %arg2[%c5, %c0_16, %c0_17] : memref<8x4x128xf32, #tpu.memory_space<vmem>>, vector<1x4x128xf32>
    %26 = vector.shape_cast %25 : vector<1x4x128xf32> to vector<4x128xf32>
    %c6 = arith.constant 6 : index
    %c0_18 = arith.constant 0 : index
    %c0_19 = arith.constant 0 : index
    %27 = vector.load %arg2[%c6, %c0_18, %c0_19] : memref<8x4x128xf32, #tpu.memory_space<vmem>>, vector<1x4x128xf32>
    %28 = vector.shape_cast %27 : vector<1x4x128xf32> to vector<4x128xf32>
    %c7 = arith.constant 7 : index
    %c0_20 = arith.constant 0 : index
    %c0_21 = arith.constant 0 : index
    %29 = vector.load %arg2[%c7, %c0_20, %c0_21] : memref<8x4x128xf32, #tpu.memory_space<vmem>>, vector<1x4x128xf32>
    %30 = vector.shape_cast %29 : vector<1x4x128xf32> to vector<4x128xf32>
    %31 = tpu.concatenate %16, %18, %20, %22, %24, %26, %28, %30 in 1 : vector<4x128xf32>, vector<4x128xf32>, vector<4x128xf32>, vector<4x128xf32>, vector<4x128xf32>, vector<4x128xf32>, vector<4x128xf32>, vector<4x128xf32> -> vector<4x1024xf32>
    %c0_22 = arith.constant 0 : index
    %c0_23 = arith.constant 0 : index
    %32 = vector.load %arg5[%c0_22, %c0_23] : memref<32x4xf32, #tpu.memory_space<vmem>>, vector<32x4xf32>
    %cst_24 = arith.constant dense<0.000000e+00> : vector<32x1024xf32>
    %33 = tpu.matmul %32, %31, %cst_24 {dimension_numbers = #tpu.dot_dimension_numbers<[1], [0], [0], [1], [0, 0, 1, 1], [], []>} : vector<32x4xf32>, vector<4x1024xf32>, vector<32x1024xf32> -> vector<32x1024xf32>
    %34 = arith.addf %14, %33 : vector<32x1024xf32>
    %cst_25 = arith.constant 0.000000e+00 : f32
    %35 = vector.broadcast %cst_25 : f32 to vector<32x1024xf32>
    %36 = arith.maximumf %34, %35 : vector<32x1024xf32>
    %c0_26 = arith.constant 0 : index
    %c0_27 = arith.constant 0 : index
    %37 = vector.load %arg6[%c0_26, %c0_27] : memref<16x32xf32, #tpu.memory_space<vmem>>, vector<16x32xf32>
    %c0_28 = arith.constant 0 : index
    %c0_29 = arith.constant 0 : index
    %38 = vector.load %arg7[%c0_28, %c0_29] : memref<16x1xf32, #tpu.memory_space<vmem>>, vector<16x1xf32>
    %cst_30 = arith.constant dense<0.000000e+00> : vector<16x1024xf32>
    %39 = tpu.matmul %37, %36, %cst_30 {dimension_numbers = #tpu.dot_dimension_numbers<[1], [0], [0], [1], [0, 0, 1, 1], [], []>} : vector<16x32xf32>, vector<32x1024xf32>, vector<16x1024xf32> -> vector<16x1024xf32>
    %40 = vector.broadcast %38 : vector<16x1xf32> to vector<16x1024xf32>
    %41 = arith.addf %39, %40 : vector<16x1024xf32>
    %cst_31 = arith.constant 0.000000e+00 : f32
    %42 = vector.broadcast %cst_31 : f32 to vector<16x1024xf32>
    %43 = arith.maximumf %41, %42 : vector<16x1024xf32>
    %44 = vector.extract_strided_slice %43 {offsets = [0, 0], sizes = [16, 128], strides = [1, 1]} : vector<16x1024xf32> to vector<16x128xf32>
    %c0_32 = arith.constant 0 : index
    %c0_33 = arith.constant 0 : index
    %c0_34 = arith.constant 0 : index
    %45 = vector.load %arg8[%c0_32, %c0_33, %c0_34] : memref<8x16x128xf32, #tpu.memory_space<vmem>>, vector<1x16x128xf32>
    %46 = vector.shape_cast %45 : vector<1x16x128xf32> to vector<16x128xf32>
    %47 = vector.shape_cast %44 : vector<16x128xf32> to vector<1x16x128xf32>
    tpu.vector_store %arg8[%c0_32, %c0_33, %c0_34], %47 {strides = array<i32>} : memref<8x16x128xf32, #tpu.memory_space<vmem>>, vector<1x16x128xf32>,
    %48 = vector.extract_strided_slice %43 {offsets = [0, 128], sizes = [16, 128], strides = [1, 1]} : vector<16x1024xf32> to vector<16x128xf32>
    %c1_35 = arith.constant 1 : index
    %c0_36 = arith.constant 0 : index
    %c0_37 = arith.constant 0 : index
    %49 = vector.load %arg8[%c1_35, %c0_36, %c0_37] : memref<8x16x128xf32, #tpu.memory_space<vmem>>, vector<1x16x128xf32>
    %50 = vector.shape_cast %49 : vector<1x16x128xf32> to vector<16x128xf32>
    %51 = vector.shape_cast %48 : vector<16x128xf32> to vector<1x16x128xf32>
    tpu.vector_store %arg8[%c1_35, %c0_36, %c0_37], %51 {strides = array<i32>} : memref<8x16x128xf32, #tpu.memory_space<vmem>>, vector<1x16x128xf32>,
    %52 = vector.extract_strided_slice %43 {offsets = [0, 256], sizes = [16, 128], strides = [1, 1]} : vector<16x1024xf32> to vector<16x128xf32>
    %c2_38 = arith.constant 2 : index
    %c0_39 = arith.constant 0 : index
    %c0_40 = arith.constant 0 : index
    %53 = vector.load %arg8[%c2_38, %c0_39, %c0_40] : memref<8x16x128xf32, #tpu.memory_space<vmem>>, vector<1x16x128xf32>
    %54 = vector.shape_cast %53 : vector<1x16x128xf32> to vector<16x128xf32>
    %55 = vector.shape_cast %52 : vector<16x128xf32> to vector<1x16x128xf32>
    tpu.vector_store %arg8[%c2_38, %c0_39, %c0_40], %55 {strides = array<i32>} : memref<8x16x128xf32, #tpu.memory_space<vmem>>, vector<1x16x128xf32>,
    %56 = vector.extract_strided_slice %43 {offsets = [0, 384], sizes = [16, 128], strides = [1, 1]} : vector<16x1024xf32> to vector<16x128xf32>
    %c3_41 = arith.constant 3 : index
    %c0_42 = arith.constant 0 : index
    %c0_43 = arith.constant 0 : index
    %57 = vector.load %arg8[%c3_41, %c0_42, %c0_43] : memref<8x16x128xf32, #tpu.memory_space<vmem>>, vector<1x16x128xf32>
    %58 = vector.shape_cast %57 : vector<1x16x128xf32> to vector<16x128xf32>
    %59 = vector.shape_cast %56 : vector<16x128xf32> to vector<1x16x128xf32>
    tpu.vector_store %arg8[%c3_41, %c0_42, %c0_43], %59 {strides = array<i32>} : memref<8x16x128xf32, #tpu.memory_space<vmem>>, vector<1x16x128xf32>,
    %60 = vector.extract_strided_slice %43 {offsets = [0, 512], sizes = [16, 128], strides = [1, 1]} : vector<16x1024xf32> to vector<16x128xf32>
    %c4_44 = arith.constant 4 : index
    %c0_45 = arith.constant 0 : index
    %c0_46 = arith.constant 0 : index
    %61 = vector.load %arg8[%c4_44, %c0_45, %c0_46] : memref<8x16x128xf32, #tpu.memory_space<vmem>>, vector<1x16x128xf32>
    %62 = vector.shape_cast %61 : vector<1x16x128xf32> to vector<16x128xf32>
    %63 = vector.shape_cast %60 : vector<16x128xf32> to vector<1x16x128xf32>
    tpu.vector_store %arg8[%c4_44, %c0_45, %c0_46], %63 {strides = array<i32>} : memref<8x16x128xf32, #tpu.memory_space<vmem>>, vector<1x16x128xf32>,
    %64 = vector.extract_strided_slice %43 {offsets = [0, 640], sizes = [16, 128], strides = [1, 1]} : vector<16x1024xf32> to vector<16x128xf32>
    %c5_47 = arith.constant 5 : index
    %c0_48 = arith.constant 0 : index
    %c0_49 = arith.constant 0 : index
    %65 = vector.load %arg8[%c5_47, %c0_48, %c0_49] : memref<8x16x128xf32, #tpu.memory_space<vmem>>, vector<1x16x128xf32>
    %66 = vector.shape_cast %65 : vector<1x16x128xf32> to vector<16x128xf32>
    %67 = vector.shape_cast %64 : vector<16x128xf32> to vector<1x16x128xf32>
    tpu.vector_store %arg8[%c5_47, %c0_48, %c0_49], %67 {strides = array<i32>} : memref<8x16x128xf32, #tpu.memory_space<vmem>>, vector<1x16x128xf32>,
    %68 = vector.extract_strided_slice %43 {offsets = [0, 768], sizes = [16, 128], strides = [1, 1]} : vector<16x1024xf32> to vector<16x128xf32>
    %c6_50 = arith.constant 6 : index
    %c0_51 = arith.constant 0 : index
    %c0_52 = arith.constant 0 : index
    %69 = vector.load %arg8[%c6_50, %c0_51, %c0_52] : memref<8x16x128xf32, #tpu.memory_space<vmem>>, vector<1x16x128xf32>
    %70 = vector.shape_cast %69 : vector<1x16x128xf32> to vector<16x128xf32>
    %71 = vector.shape_cast %68 : vector<16x128xf32> to vector<1x16x128xf32>
    tpu.vector_store %arg8[%c6_50, %c0_51, %c0_52], %71 {strides = array<i32>} : memref<8x16x128xf32, #tpu.memory_space<vmem>>, vector<1x16x128xf32>,
    %72 = vector.extract_strided_slice %43 {offsets = [0, 896], sizes = [16, 128], strides = [1, 1]} : vector<16x1024xf32> to vector<16x128xf32>
    %c7_53 = arith.constant 7 : index
    %c0_54 = arith.constant 0 : index
    %c0_55 = arith.constant 0 : index
    %73 = vector.load %arg8[%c7_53, %c0_54, %c0_55] : memref<8x16x128xf32, #tpu.memory_space<vmem>>, vector<1x16x128xf32>
    %74 = vector.shape_cast %73 : vector<1x16x128xf32> to vector<16x128xf32>
    %75 = vector.shape_cast %72 : vector<16x128xf32> to vector<1x16x128xf32>
    tpu.vector_store %arg8[%c7_53, %c0_54, %c0_55], %75 {strides = array<i32>} : memref<8x16x128xf32, #tpu.memory_space<vmem>>, vector<1x16x128xf32>,
    return
  }
  func.func @transform_0(%arg0: i32) -> (i32, i32) {
    %c0_i32 = arith.constant 0 : i32
    %c0_i32_0 = arith.constant 0 : i32
    return %c0_i32, %arg0 : i32, i32
  }
  func.func @transform_1(%arg0: i32) -> (i32, i32, i32) {
    %c0_i32 = arith.constant 0 : i32
    %c0_i32_0 = arith.constant 0 : i32
    %c0_i32_1 = arith.constant 0 : i32
    return %c0_i32, %c0_i32_0, %arg0 : i32, i32, i32
  }
  func.func @transform_2(%arg0: i32) -> (i32, i32) {
    %c0_i32 = arith.constant 0 : i32
    %c0_i32_0 = arith.constant 0 : i32
    %c0_i32_1 = arith.constant 0 : i32
    return %c0_i32, %c0_i32_0 : i32, i32
  }
  func.func @transform_3(%arg0: i32) -> (i32, i32) {
    %c0_i32 = arith.constant 0 : i32
    %c0_i32_0 = arith.constant 0 : i32
    %c0_i32_1 = arith.constant 0 : i32
    return %c0_i32, %c0_i32_0 : i32, i32
  }
  func.func @transform_4(%arg0: i32) -> (i32, i32) {
    %c0_i32 = arith.constant 0 : i32
    %c0_i32_0 = arith.constant 0 : i32
    %c0_i32_1 = arith.constant 0 : i32
    return %c0_i32, %c0_i32_0 : i32, i32
  }
  func.func @transform_5(%arg0: i32) -> (i32, i32) {
    %c0_i32 = arith.constant 0 : i32
    %c0_i32_0 = arith.constant 0 : i32
    %c0_i32_1 = arith.constant 0 : i32
    return %c0_i32, %c0_i32_0 : i32, i32
  }
  func.func @transform_6(%arg0: i32) -> (i32, i32) {
    %c0_i32 = arith.constant 0 : i32
    %c0_i32_0 = arith.constant 0 : i32
    %c0_i32_1 = arith.constant 0 : i32
    return %c0_i32, %c0_i32_0 : i32, i32
  }
  func.func @transform_7(%arg0: i32) -> (i32, i32, i32) {
    %c0_i32 = arith.constant 0 : i32
    %c0_i32_0 = arith.constant 0 : i32
    %c0_i32_1 = arith.constant 0 : i32
    return %c0_i32, %c0_i32_0, %arg0 : i32, i32, i32
  }
}

</mosaic_0001>

<bundles_post_ra>
// kernel: one_shot_decoder_forward.1
= control target key start
LH: loop header
LB: loop body
LE: loop exit
PB: predicated region body
PF: predicated region fallthrough
CT: control target
= control target key end

     0   :  { %12 = vsyncpa [#allocation3], 0  ;;  %s2058_s0 = inlined_call_operand.vmem [shape: f32[8,128], index: 0, kind: input, shape index: {}]   ;;  %s2059_s1 = inlined_call_operand.vmem [shape: f32[8,4,128], index: 1, kind: input, shape index: {}]   ;;  %s2060_s2 = inlined_call_operand.hbm [shape: f32[256,8], index: 2, kind: input, shape index: {}]   ;;  %s2061_s3 = inlined_call_operand.hbm [shape: f32[256,1], index: 3, kind: input, shape index: {}]   ;;  %s2062_s4 = inlined_call_operand.vmem [shape: f32[32,4], index: 4, kind: input, shape index: {}]   ;;  %s2063_s5 = inlined_call_operand.vmem [shape: f32[16,32], index: 5, kind: input, shape index: {}]   ;;  %s2064_s6 = inlined_call_operand.vmem [shape: f32[16,1], index: 6, kind: input, shape index: {}]   ;;  %s2065_s7 = inlined_call_operand.vmem [shape: f32[8,16,128], index: 7, kind: output, shape index: {}]  }
   0x1   :  { %13 = vsyncpa [#allocation5], 0  ;;  %s1708_s24 = smov [#allocation2]   ;;  %s1660_s28 = scalar_lea.hbm %s2060_s2, 4096 }
   0x2   :  { %s23_s25 = sshll.u32 %s1708_s24, 4  ;;  %p1661_p0 = scmp.ne.s32.totalorder %s2060_s2, %s1660_s28  ;;  %s24_s25 = int_to_ptr.vmem [resolvable:$true] %s23_s25 }
   0x3   :  { %p1664_p1 = scmp.lt.u32.totalorder %s1660_s28, %s2060_s2 }
   0x5   :  { %p1666_p2 = pnand %p1664_p1, %p1661_p0 }
   0x7   :  { %1669 = shalt.err (!%p1666_p2)
}
   0x8   :  { %s1670_s10 = scalar_lea.vmem %s24_s25, 4096  ;;  %p1675_p4 = scmp.lt.s32.totalorder %s24_s25, %s24_s25 }
   0x9   :  { %p1671_p3 = scmp.ne.s32.totalorder %s24_s25, %s1670_s10  ;;  %p1676_p5 = scmp.lt.s32.totalorder %s1670_s10, %s1670_s10 }
   0xb   :  { %p1677_p6 = por %p1676_p5, %p1675_p4 }
   0xd   :  { %p1678_p7 = pnand %p1677_p6, %p1671_p3 }
   0xf   :  { %1681 = shalt.err (!%p1678_p7)
}
  0x10   :  { %s1709_s11 = smov 128   ;;  %s1710_s12 = smov 8  }
  0x11   :  { %29 = dma.hbm_to_vmem [thread:$0]  %s2060_s2, 4096, %s24_s25, [#allocation3], %s1709_s11, %s1709_s11, %s1710_s12  }
  0x12   :  { %s1711_s15 = smov [#allocation4]   ;;  %s1682_s19 = scalar_lea.hbm %s2061_s3, 4096 }
  0x13   :  { %s35_s16 = sshll.u32 %s1711_s15, 4  ;;  %p1683_p8 = scmp.ne.s32.totalorder %s2061_s3, %s1682_s19  ;;  %s36_s16 = int_to_ptr.vmem [resolvable:$true] %s35_s16 }
  0x14   :  { %p1686_p9 = scmp.lt.u32.totalorder %s1682_s19, %s2061_s3 }
  0x16   :  { %p1688_p10 = pnand %p1686_p9, %p1683_p8 }
  0x18   :  { %1691 = shalt.err (!%p1688_p10)
}
  0x19   :  { %s1692_s24 = scalar_lea.vmem %s36_s16, 4096  ;;  %p1697_p12 = scmp.lt.s32.totalorder %s36_s16, %s36_s16 }
  0x1a   :  { %p1693_p11 = scmp.ne.s32.totalorder %s36_s16, %s1692_s24  ;;  %p1698_p13 = scmp.lt.s32.totalorder %s1692_s24, %s1692_s24 }
  0x1c   :  { %p1699_p0 = por %p1698_p13, %p1697_p12 }
  0x1e   :  { %p1700_p1 = pnand %p1699_p0, %p1693_p11 }
  0x20   :  { %1703 = shalt.err (!%p1700_p1)
}
  0x21   :  { %41 = dma.hbm_to_vmem [thread:$0]  %s2061_s3, 4096, %s36_s16, [#allocation5], %s1709_s11, %s1709_s11, %s1710_s12  }
  0x22   :  { %1704 = dma.done.wait [#allocation3], 4096  }
  0x23   :  { %1705 = vsyncadd [#allocation3], 4294963200 }
  0x24   :  { %1706 = dma.done.wait [#allocation5], 4096  }
  0x25   :  { %1707 = vsyncadd [#allocation5], 4294963200  ;;  %v1712_v0 = vmov 0.0   ;;  %v1713_v1 = vmov 0   ;;  %vm633_vm0 = vcmask 1043456   ;;  %vm279_vm1 = vcmask 64512  }
  0x26   :  { %722 = vmatprep.mubr.f32.mxu1 %v1712_v0  ;;  %1659 = vset.pattern.permute.xlu1 %v1713_v1  ;;  %v86_v2 = vld [vmem:[%s2058_s0] sm:$0xff]  ;;  %v54_v4 = vld [vmem:[#allocation2] sm:$0xff]  ;;  %v55_v6 = vld [vmem:[#allocation2 + $0x8] sm:$0xff]  ;;  %vm620_vm2 = vcmask 31744   ;;  %vm1092_vm3 = vcmask 261120  }
  0x27   :  { %1658 = vset.pattern.permute.xlu0 %v1713_v1  ;;  %v1484_v3 = vld [vmem:[%s2059_s1 + $0x4] sm:$0xf]  ;;  %1570 = vmatprep.subr.mxu0 %v86_v2  ;;  %v601_v5 = vld [vmem:[%s2059_s1] sm:$0xf]  ;;  %v56_v8 = vld [vmem:[#allocation2 + $0x10] sm:$0xff] }
  0x28   :  { %1491 = vmatprep.subr.msk.mxu1 %vm633_vm0, %v1484_v3  ;;  %v1792_v7 = vld [vmem:[%s2062_s4] sm:$0xff]  ;;  %1571 = vmatpush3.msra.mxu0 %v86_v2  ;;  %v1803_v10 = vld [vmem:[%s2062_s4 + $0x8] sm:$0xff]  ;;  %v59_v16 = vld [vmem:[#allocation2 + $0x28] sm:$0xff] }
  0x29   :  { %1572 = vmatprep.mubr.msk.f32.mxu0 %vm279_vm1, %v54_v4  ;;  %1492 = vmatpush1.msk.msra.mxu1 %vm633_vm0, %v601_v5  ;;  %v57_v9 = vld [vmem:[#allocation2 + $0x18] sm:$0xff]  ;;  %v58_v11 = vld [vmem:[#allocation2 + $0x20] sm:$0xff]  ;;  %v1822_v17 = vld [vmem:[%s2062_s4 + $0x10] sm:$0xff] }
  0x2a   :  { %1573 = vmatmul.mubr.msk.f32.vlgmr.msra.gmra.mrb[0].mxu0 %vm279_vm1, %v55_v6  ;;  %1493 = vmatmul.mubr.msk.f32.vlgmr.msra.gmra.mrb[0].mxu1 %vm620_vm2, %v1792_v7  ;;  %v1486_v12 = vld [vmem:[%s2059_s1 + $0xc] sm:$0xf]  ;;  %v1485_v13 = vld [vmem:[%s2059_s1 + $0x8] sm:$0xf]  ;;  %v60_v18 = vld [vmem:[#allocation2 + $0x30] sm:$0xff] }
  0x2b   :  { %1575 = vmatprep.mubr.msk.f32.mxu0 %vm279_vm1, %v56_v8  ;;  %728 = vmatprep.mubr.f32.mxu1 %v1712_v0  ;;  %v99_v14 = vld [vmem:[#allocation4 + $0x60] sm:$0xff]  ;;  %v1488_v19 = vld [vmem:[%s2059_s1 + $0x14] sm:$0xf]  ;;  %v61_v22 = vld [vmem:[#allocation2 + $0x38] sm:$0xff] }
  0x2c   :  { %1497 = vmatprep.subr.msk.mxu1 %vm633_vm0, %v1486_v12  ;;  %v91_v15 = vld [vmem:[#allocation4 + $0x20] sm:$0xff]  ;;  %181 = vperm.xlu1 %1659, %v99_v14   ;;  %v100_v20 = vld [vmem:[#allocation4 + $0x68] sm:$0xff]  ;;  %v1836_v23 = vld [vmem:[%s2062_s4 + $0x18] sm:$0xff] }
  0x2d   :  { %1498 = vmatpush1.msk.msra.mxu1 %vm633_vm0, %v1485_v13  ;;  %141 = vperm.xlu0 %1658, %v91_v15   ;;  %v92_v21 = vld [vmem:[#allocation4 + $0x28] sm:$0xff]  ;;  %v62_v24 = vld [vmem:[#allocation2 + $0x40] sm:$0xff]  ;;  %v64_v28 = vld [vmem:[#allocation2 + $0x50] sm:$0xff] }
  0x2e   :  { %1576 = vmatmul.mubr.msk.f32.gmra.mrb[2].mxu0 %vm279_vm1, %v57_v9  ;;  %1494 = vmatmul.mubr.msk.f32.gmra.mrb[2].mxu1 %vm620_vm2, %v1803_v10  ;;  %v88_v25 = vld [vmem:[#allocation4 + $0x8] sm:$0xff]  ;;  %v87_v26 = vld [vmem:[#allocation4] sm:$0xff]  ;;  %v65_v32 = vld [vmem:[#allocation2 + $0x58] sm:$0xff] }
  0x2f   :  { %1578 = vmatprep.mubr.msk.f32.mxu0 %vm279_vm1, %v58_v11  ;;  %734 = vmatprep.mubr.f32.mxu1 %v1712_v0  ;;  %v63_v27 = vld [vmem:[#allocation2 + $0x48] sm:$0xff]  ;;  %v95_v31 = vld [vmem:[#allocation4 + $0x40] sm:$0xff]  ;;  %v1490_v33 = vld [vmem:[%s2059_s1 + $0x1c] sm:$0xf] }
  0x30   :  { %1503 = vmatprep.subr.msk.mxu1 %vm633_vm0, %v1488_v19  ;;  %186 = vperm.xlu1 %1659, %v100_v20   ;;  %v1487_v29 = vld [vmem:[%s2059_s1 + $0x10] sm:$0xf]  ;;  %v66_v34 = vld [vmem:[#allocation2 + $0x60] sm:$0xff]  ;;  %v94_v35 = vld [vmem:[#allocation4 + $0x38] sm:$0xff] }
  0x31   :  { %146 = vperm.xlu0 %1658, %v92_v21   ;;  %v96_v30 = vld [vmem:[#allocation4 + $0x48] sm:$0xff]  ;;  %v93_v36 = vld [vmem:[#allocation4 + $0x30] sm:$0xff]  ;;  %v102_v39 = vld [vmem:[#allocation4 + $0x78] sm:$0xff] }
  0x32   :  { %1579 = vmatmul.mubr.msk.f32.gmra.mrb[4].mxu0 %vm279_vm1, %v59_v16  ;;  %1495 = vmatmul.mubr.msk.f32.gmra.mrb[4].mxu1 %vm620_vm2, %v1822_v17  ;;  %v67_v37 = vld [vmem:[#allocation2 + $0x68] sm:$0xff]  ;;  %v68_v38 = vld [vmem:[#allocation2 + $0x70] sm:$0xff]  ;;  %v69_v41 = vld [vmem:[#allocation2 + $0x78] sm:$0xff] }
  0x33   :  { %1581 = vmatprep.mubr.msk.f32.mxu0 %vm279_vm1, %v60_v18  ;;  %740 = vmatprep.mubr.f32.mxu1 %v1712_v0  ;;  %v101_v40 = vld [vmem:[#allocation4 + $0x70] sm:$0xff]  ;;  %v70_v42 = vld [vmem:[#allocation2 + $0x80] sm:$0xff]  ;;  %v90_v43 = vld [vmem:[#allocation4 + $0x18] sm:$0xff] }
  0x34   :  { %126 = vperm.xlu1 %1659, %v88_v25   ;;  %v89_v44 = vld [vmem:[#allocation4 + $0x10] sm:$0xff]  ;;  %v71_v45 = vld [vmem:[#allocation2 + $0x88] sm:$0xff]  ;;  %v98_v48 = vld [vmem:[#allocation4 + $0x58] sm:$0xff] }
  0x35   :  { %121 = vperm.xlu0 %1658, %v87_v26   ;;  %v72_v46 = vld [vmem:[#allocation2 + $0x90] sm:$0xff]  ;;  %v73_v50 = vld [vmem:[#allocation2 + $0x98] sm:$0xff]  ;;  %v74_v51 = vld [vmem:[#allocation2 + $0xa0] sm:$0xff] }
  0x36   :  { %1582 = vmatmul.mubr.msk.f32.gmra.mrb[6].mxu0 %vm279_vm1, %v61_v22  ;;  %1496 = vmatmul.mubr.msk.f32.gmra.mrb[6].mxu1 %vm620_vm2, %v1836_v23  ;;  %v1489_v47 = vld [vmem:[%s2059_s1 + $0x18] sm:$0xf]  ;;  %v108_v52 = vld [vmem:[#allocation4 + $0xa8] sm:$0xff]  ;;  %v107_v53 = vld [vmem:[#allocation4 + $0xa0] sm:$0xff] }
  0x37   :  { %1584 = vmatprep.mubr.msk.f32.mxu0 %vm279_vm1, %v62_v24  ;;  %811 = vmatprep.mubr.f32.mxu1 %v1712_v0  ;;  %v97_v49 = vld [vmem:[#allocation4 + $0x50] sm:$0xff]  ;;  %v75_v54 = vld [vmem:[#allocation2 + $0xa8] sm:$0xff]  ;;  %v115_v57 = vld [vmem:[#allocation4 + $0xe0] sm:$0xff] }
  0x38   :  { %166 = vperm.xlu1 %1659, %v96_v30   ;;  %v76_v55 = vld [vmem:[#allocation2 + $0xb0] sm:$0xff]  ;;  %v116_v56 = vld [vmem:[#allocation4 + $0xe8] sm:$0xff]  ;;  %v77_v58 = vld [vmem:[#allocation2 + $0xb8] sm:$0xff] }
  0x39   :  { %161 = vperm.xlu0 %1658, %v95_v31   ;;  %v78_v59 = vld [vmem:[#allocation2 + $0xc0] sm:$0xff]  ;;  %v104_v60 = vld [vmem:[#allocation4 + $0x88] sm:$0xff]  ;;  %v80_v63 = vld [vmem:[#allocation2 + $0xd0] sm:$0xff] }
  0x3a   :  { %1585 = vmatmul.mubr.msk.f32.gmra.mrb[8].mxu0 %vm279_vm1, %v63_v27  ;;  %1499 = vmatmul.mubr.msk.f32.vlgmr.msra.gmra.mrb[8].mxu1 %vm620_vm2, %v1792_v7  ;;  %v103_v61 = vld [vmem:[#allocation4 + $0x80] sm:$0xff]  ;;  %v79_v62 = vld [vmem:[#allocation2 + $0xc8] sm:$0xff]  ;;  %v81_v3 = vld [vmem:[#allocation2 + $0xd8] sm:$0xff] }
  0x3b   :  { %1587 = vmatprep.mubr.msk.f32.mxu0 %vm279_vm1, %v64_v28  ;;  %817 = vmatprep.mubr.f32.mxu1 %v1712_v0  ;;  %v112_v1 = vld [vmem:[#allocation4 + $0xc8] sm:$0xff]  ;;  %v111_v2 = vld [vmem:[#allocation4 + $0xc0] sm:$0xff]  ;;  %v110_v5 = vld [vmem:[#allocation4 + $0xb8] sm:$0xff] }
  0x3c   :  { %1504 = vmatpush1.msk.msra.mxu1 %vm633_vm0, %v1487_v29  ;;  %156 = vperm.xlu1 %1659, %v94_v35   ;;  %v82_v4 = vld [vmem:[#allocation2 + $0xe0] sm:$0xff]  ;;  %v109_v6 = vld [vmem:[#allocation4 + $0xb0] sm:$0xff]  ;;  %v83_v8 = vld [vmem:[#allocation2 + $0xe8] sm:$0xff] }
  0x3d   :  { %1509 = vmatprep.subr.msk.mxu1 %vm633_vm0, %v1490_v33  ;;  %151 = vperm.xlu0 %1658, %v93_v36   ;;  %v118_v9 = vld [vmem:[#allocation4 + $0xf8] sm:$0xff]  ;;  %v117_v11 = vld [vmem:[#allocation4 + $0xf0] sm:$0xff]  ;;  %v1081_v16 = vld [vmem:[%s2064_s6 + $0x8] sm:$0xff] }
  0x3e   :  { %1588 = vmatmul.mubr.msk.f32.gmra.mrb[10].mxu0 %vm279_vm1, %v65_v32  ;;  %1500 = vmatmul.mubr.msk.f32.gmra.mrb[10].mxu1 %vm620_vm2, %v1803_v10  ;;  %v85_v12 = vld [vmem:[#allocation2 + $0xf8] sm:$0xff]  ;;  %v105_v13 = vld [vmem:[#allocation4 + $0x90] sm:$0xff] }
  0x3f   :  { %1590 = vmatprep.mubr.msk.f32.mxu0 %vm279_vm1, %v66_v34  ;;  %823 = vmatprep.mubr.f32.mxu1 %v1712_v0  ;;  %v114_v14 = vld [vmem:[#allocation4 + $0xd8] sm:$0xff]  ;;  %v113_v15 = vld [vmem:[#allocation4 + $0xd0] sm:$0xff] }
  0x40   :  { %196 = vperm.xlu1 %1659, %v102_v39  }
  0x41   :  { %191 = vperm.xlu0 %1658, %v101_v40  }
  0x42   :  { %1591 = vmatmul.mubr.msk.f32.gmra.mrb[12].mxu0 %vm279_vm1, %v67_v37  ;;  %1501 = vmatmul.mubr.msk.f32.gmra.mrb[12].mxu1 %vm620_vm2, %v1822_v17 }
  0x43   :  { %1593 = vmatprep.mubr.msk.f32.mxu0 %vm279_vm1, %v68_v38  ;;  %829 = vmatprep.mubr.f32.mxu1 %v1712_v0 }
  0x44   :  { %136 = vperm.xlu1 %1659, %v90_v43  }
  0x45   :  { %131 = vperm.xlu0 %1658, %v89_v44  }
  0x46   :  { %1594 = vmatmul.mubr.msk.f32.gmra.mrb[14].mxu0 %vm279_vm1, %v69_v41  ;;  %1502 = vmatmul.mubr.msk.f32.gmra.mrb[14].mxu1 %vm620_vm2, %v1836_v23 }
  0x47   :  { %1596 = vmatprep.mubr.msk.f32.mxu0 %vm279_vm1, %v70_v42  ;;  %900 = vmatprep.mubr.f32.mxu1 %v1712_v0 }
  0x48   :  { %176 = vperm.xlu1 %1659, %v98_v48  }
  0x49   :  { %171 = vperm.xlu0 %1658, %v97_v49  }
  0x4a   :  { %1597 = vmatmul.mubr.msk.f32.gmra.mrb[16].mxu0 %vm279_vm1, %v71_v45  ;;  %1505 = vmatmul.mubr.msk.f32.vlgmr.msra.gmra.mrb[16].mxu1 %vm620_vm2, %v1792_v7 }
  0x4b   :  { %1599 = vmatprep.mubr.msk.f32.mxu0 %vm279_vm1, %v72_v46  ;;  %906 = vmatprep.mubr.f32.mxu1 %v1712_v0 }
  0x4c   :  { %1510 = vmatpush1.msk.msra.mxu1 %vm633_vm0, %v1489_v47  ;;  %226 = vperm.xlu1 %1659, %v108_v52  }
  0x4d   :  { %221 = vperm.xlu0 %1658, %v107_v53  }
  0x4e   :  { %1600 = vmatmul.mubr.msk.f32.gmra.mrb[18].mxu0 %vm279_vm1, %v73_v50  ;;  %1506 = vmatmul.mubr.msk.f32.gmra.mrb[18].mxu1 %vm620_vm2, %v1803_v10 }
  0x4f   :  { %1602 = vmatprep.mubr.msk.f32.mxu0 %vm279_vm1, %v74_v51  ;;  %912 = vmatprep.mubr.f32.mxu1 %v1712_v0 }
  0x50   :  { %266 = vperm.xlu1 %1659, %v116_v56  }
  0x51   :  { %261 = vperm.xlu0 %1658, %v115_v57  }
  0x52   :  { %1603 = vmatmul.mubr.msk.f32.gmra.mrb[20].mxu0 %vm279_vm1, %v75_v54  ;;  %1507 = vmatmul.mubr.msk.f32.gmra.mrb[20].mxu1 %vm620_vm2, %v1822_v17 }
  0x53   :  { %1605 = vmatprep.mubr.msk.f32.mxu0 %vm279_vm1, %v76_v55  ;;  %918 = vmatprep.mubr.f32.mxu1 %v1712_v0 }
  0x54   :  { %206 = vperm.xlu1 %1659, %v104_v60  }
  0x55   :  { %201 = vperm.xlu0 %1658, %v103_v61  }
  0x56   :  { %1606 = vmatmul.mubr.msk.f32.gmra.mrb[22].mxu0 %vm279_vm1, %v77_v58  ;;  %1508 = vmatmul.mubr.msk.f32.gmra.mrb[22].mxu1 %vm620_vm2, %v1836_v23 }
  0x57   :  { %1608 = vmatprep.mubr.msk.f32.mxu0 %vm279_vm1, %v78_v59  ;;  %989 = vmatprep.mubr.f32.mxu1 %v1712_v0 }
  0x58   :  { %246 = vperm.xlu1 %1659, %v112_v1  }
  0x59   :  { %241 = vperm.xlu0 %1658, %v111_v2  }
  0x5a   :  { %1609 = vmatmul.mubr.msk.f32.gmra.mrb[24].mxu0 %vm279_vm1, %v79_v62  ;;  %1511 = vmatmul.mubr.msk.f32.vlgmr.msra.gmra.mrb[24].mxu1 %vm620_vm2, %v1792_v7  ;;  %v84_v7 = vld [vmem:[#allocation2 + $0xf0] sm:$0xff] }
  0x5b   :  { %1611 = vmatprep.mubr.msk.f32.mxu0 %vm279_vm1, %v80_v63  ;;  %995 = vmatprep.mubr.f32.mxu1 %v1712_v0 }
  0x5c   :  { %236 = vperm.xlu1 %1659, %v110_v5  }
  0x5d   :  { %231 = vperm.xlu0 %1658, %v109_v6  }
  0x5e   :  { %1612 = vmatmul.mubr.msk.f32.gmra.mrb[26].mxu0 %vm279_vm1, %v81_v3  ;;  %1512 = vmatmul.mubr.msk.f32.gmra.mrb[26].mxu1 %vm620_vm2, %v1803_v10  ;;  %v106_v10 = vld [vmem:[#allocation4 + $0x98] sm:$0xff] }
  0x5f   :  { %1614 = vmatprep.mubr.msk.f32.mxu0 %vm279_vm1, %v82_v4  ;;  %1001 = vmatprep.mubr.f32.mxu1 %v1712_v0 }
  0x60   :  { %276 = vperm.xlu1 %1659, %v118_v9  }
  0x61   :  { %271 = vperm.xlu0 %1658, %v117_v11  }
  0x62   :  { %1615 = vmatmul.mubr.msk.f32.gmra.mrb[28].mxu0 %vm279_vm1, %v83_v8  ;;  %1513 = vmatmul.mubr.msk.f32.gmra.mrb[28].mxu1 %vm620_vm2, %v1822_v17  ;;  %v1080_v17 = vld [vmem:[%s2064_s6] sm:$0xff] }
  0x63   :  { %1617 = vmatprep.mubr.msk.f32.mxu0 %vm279_vm1, %v84_v7  ;;  %1007 = vmatprep.mubr.f32.mxu1 %v1712_v0 }
  0x64   :  { %216 = vperm.xlu1 %1659, %v106_v10  }
  0x65   :  { %211 = vperm.xlu0 %1658, %v105_v13  }
  0x66   :  { %1618 = vmatmul.mubr.msk.f32.gmra.mrb[30].mxu0 %vm279_vm1, %v85_v12  ;;  %1514 = vmatmul.mubr.msk.f32.gmra.mrb[30].mxu1 %vm620_vm2, %v1836_v23 }
  0x67   :  { %1163 = vmatprep.mubr.f32.mxu0 %v1712_v0  ;;  %1240 = vmatprep.mubr.f32.mxu1 %v1712_v0 }
  0x68   :  { %256 = vperm.xlu1 %1659, %v114_v14  }
  0x69   :  { %251 = vperm.xlu0 %1658, %v113_v15  }
  0x6c   :  { %1089 = vperm.xlu1 %1659, %v1081_v16  }
  0x6d   :  { %1084 = vperm.xlu0 %1658, %v1080_v17  }
  0xab   :  { %v1921_v19 = vpop.permute.xlu1 %181 }
  0xac   :  { %v142_v18 = vpop.permute.xlu0 %141 }
  0xaf   :  { %v1923_v21 = vpop.permute.xlu1 %186 }
  0xb0   :  { %v147_v20 = vpop.permute.xlu0 %146 }
  0xb3   :  { %v127_v23 = vpop.permute.xlu1 %126 }
  0xb4   :  { %v122_v22 = vpop.permute.xlu0 %121 }
  0xb7   :  { %v1927_v25 = vpop.permute.xlu1 %166 }
  0xb8   :  { %v1925_v24 = vpop.permute.xlu0 %161 }
  0xbb   :  { %v157_v27 = vpop.permute.xlu1 %156 }
  0xbc   :  { %v152_v26 = vpop.permute.xlu0 %151 }
  0xbf   :  { %v1931_v29 = vpop.permute.xlu1 %196 }
  0xc0   :  { %v1929_v28 = vpop.permute.xlu0 %191 }
  0xc3   :  { %v137_v31 = vpop.permute.xlu1 %136 }
  0xc4   :  { %v132_v30 = vpop.permute.xlu0 %131 }
  0xc7   :  { %v1935_v33 = vpop.permute.xlu1 %176 }
  0xc8   :  { %v1933_v32 = vpop.permute.xlu0 %171 }
  0xcb   :  { %v1939_v40 = vpop.permute.xlu1 %226 }
  0xcc   :  { %v1937_v34 = vpop.permute.xlu0 %221 }
  0xcf   :  { %v1943_v56 = vpop.permute.xlu1 %266 }
  0xd0   :  { %v1941_v46 = vpop.permute.xlu0 %261 }
  0xd3   :  { %v1947_v10 = vpop.permute.xlu1 %206 }
  0xd4   :  { %v1945_v62 = vpop.permute.xlu0 %201 }
  0xfd   :  { %v1574_v35 = vpop.f32.mrb[0].mxu0  ;;  %v724_v37 = vpop.f32.mrb[0].mxu1 }
  0xfe   :  { %v442_v36 = vpop.f32.mrb[1].mxu0  ;;  %v726_v39 = vpop.f32.mrb[1].mxu1  ;;  %v448_v41 = vadd.f32 %v1574_v35, %v127_v23 }
  0xff   :  { %v443_v38 = vadd.f32 %v442_v36, %v122_v22  ;;  %v1949_v23 = vpop.permute.xlu0 %241 }
 0x101   :  { %v1014_v42 = vadd.f32 %v724_v37, %v443_v38  ;;  %v1577_v43 = vpop.f32.mrb[2].mxu0  ;;  %v730_v44 = vpop.f32.mrb[2].mxu1 }
 0x102   :  { %v452_v45 = vpop.f32.mrb[3].mxu0  ;;  %v1022_v48 = vadd.f32 %v730_v44, %v448_v41  ;;  %v732_v50 = vpop.f32.mrb[3].mxu1  ;;  %v458_v63 = vadd.f32 %v1577_v43, %v137_v31 }
 0x103   :  { %v1046_v47 = vmax.f32 %v1014_v42, 0.0  ;;  %v453_v49 = vadd.f32 %v452_v45, %v132_v30  ;;  %v1953_v42 = vpop.permute.xlu1 %246 }
 0x104   :  { %v1054_v51 = vmax.f32 %v1022_v48, 0.0 }
 0x105   :  { %v1580_v52 = vpop.f32.mrb[4].mxu0  ;;  %v736_v54 = vpop.f32.mrb[4].mxu1 }
 0x106   :  { %v468_v53 = vadd.f32 %v1580_v52, %v147_v20  ;;  %v462_v55 = vpop.f32.mrb[5].mxu0  ;;  %v1622_v57 = vpack.c.bf16 %v1054_v51, %v1046_v47  ;;  %v1030_v58 = vadd.f32 %v736_v54, %v453_v49  ;;  %v738_v60 = vpop.f32.mrb[5].mxu1 }
 0x107   :  { %v463_v59 = vadd.f32 %v462_v55, %v142_v18 }
 0x108   :  { %v1023_v61 = vadd.f32 %v732_v50, %v468_v53  ;;  %v1062_v13 = vmax.f32 %v1030_v58, 0.0  ;;  %v1971_v58 = vld [vmem:[%s2063_s5 + $0x8] sm:$0xff] }
 0x109   :  { %v1015_v1 = vadd.f32 %v726_v39, %v463_v59  ;;  %v1583_v2 = vpop.f32.mrb[6].mxu0  ;;  %v742_v5 = vpop.f32.mrb[6].mxu1 }
 0x10a   :  { %v1055_v3 = vmax.f32 %v1023_v61, 0.0  ;;  %v478_v4 = vadd.f32 %v1583_v2, %v157_v27  ;;  %v472_v6 = vpop.f32.mrb[7].mxu0  ;;  %v1038_v7 = vadd.f32 %v742_v5, %v458_v63  ;;  %v744_v11 = vpop.f32.mrb[7].mxu1 }
 0x10b   :  { %v1047_v8 = vmax.f32 %v1015_v1, 0.0  ;;  %v473_v9 = vadd.f32 %v472_v6, %v152_v26  ;;  %v237_v59 = vpop.permute.xlu1 %236 }
 0x10c   :  { %v1039_v12 = vadd.f32 %v744_v11, %v478_v4  ;;  %v1070_v14 = vmax.f32 %v1038_v7, 0.0 }
 0x10d   :  { %v1031_v15 = vadd.f32 %v738_v60, %v473_v9  ;;  %v1586_v16 = vpop.f32.mrb[8].mxu0  ;;  %v1620_v17 = vpack.c.bf16 %v1055_v3, %v1047_v8  ;;  %v813_v22 = vpop.f32.mrb[8].mxu1 }
 0x10e   :  { %v1071_v18 = vmax.f32 %v1039_v12, 0.0  ;;  %v482_v20 = vpop.f32.mrb[9].mxu0  ;;  %v1626_v27 = vpack.c.bf16 %v1070_v14, %v1062_v13  ;;  %v815_v26 = vpop.f32.mrb[9].mxu1  ;;  %v488_v36 = vadd.f32 %v1586_v16, %v1927_v25 }
 0x10f   :  { %v1063_v30 = vmax.f32 %v1031_v15, 0.0  ;;  %v483_v31 = vadd.f32 %v482_v20, %v1925_v24  ;;  %1621 = vmatprep.subr.bf16.mxu0 %v1620_v17  ;;  %v1959_v24 = vld [vmem:[%s2063_s5] sm:$0xff]  ;;  %v1961_v25 = vpop.permute.xlu0 %231  ;;  %v1982_v20 = vpop.permute.xlu1 %276 }
 0x110   :  { %1623 = vmatpush1.bf16.msra.mxu0 %v1622_v57 }
 0x111   :  { %v1624_v35 = vpack.c.bf16 %v1071_v18, %v1063_v30  ;;  %v1016_v37 = vadd.f32 %v813_v22, %v483_v31  ;;  %v1589_v38 = vpop.f32.mrb[10].mxu0  ;;  %v819_v39 = vpop.f32.mrb[10].mxu1 }
 0x112   :  { %v492_v41 = vpop.f32.mrb[11].mxu0  ;;  %v1024_v44 = vadd.f32 %v819_v39, %v488_v36  ;;  %v821_v47 = vpop.f32.mrb[11].mxu1 }
 0x113   :  { %v1048_v43 = vmax.f32 %v1016_v37, 0.0  ;;  %v493_v45 = vadd.f32 %v492_v41, %v1933_v32  ;;  %1625 = vmatprep.subr.bf16.mxu0 %v1624_v35  ;;  %v1975_v3 = vpop.permute.xlu0 %271 }
 0x114   :  { %1627 = vmatpush1.bf16.msra.mxu0 %v1626_v27  ;;  %v1056_v48 = vmax.f32 %v1024_v44, 0.0 }
 0x115   :  { %v1592_v49 = vpop.f32.mrb[12].mxu0  ;;  %v825_v51 = vpop.f32.mrb[12].mxu1 }
 0x116   :  { %v508_v50 = vadd.f32 %v1592_v49, %v1923_v21  ;;  %v502_v52 = vpop.f32.mrb[13].mxu0  ;;  %v1630_v53 = vpack.c.bf16 %v1056_v48, %v1048_v43  ;;  %v1032_v54 = vadd.f32 %v825_v51, %v493_v45  ;;  %v827_v55 = vpop.f32.mrb[13].mxu1  ;;  %v498_v21 = vadd.f32 %v1589_v38, %v1935_v33 }
 0x117   :  { %v503_v32 = vadd.f32 %v502_v52, %v1921_v19  ;;  %1515 = vmatmul.mubr.msk.f32.vlgmr.msra.gmra.mrb[32].mxu0 %vm1092_vm3, %v1959_v24  ;;  %v212_v22 = vpop.permute.xlu0 %211  ;;  %v217_v51 = vpop.permute.xlu1 %216 }
 0x118   :  { %v1025_v57 = vadd.f32 %v821_v47, %v508_v50  ;;  %1169 = vmatprep.mubr.f32.mxu0 %v1712_v0  ;;  %v1064_v33 = vmax.f32 %v1032_v54, 0.0 }
 0x119   :  { %v1017_v60 = vadd.f32 %v815_v26, %v503_v32  ;;  %v1595_v61 = vpop.f32.mrb[14].mxu0  ;;  %v831_v1 = vpop.f32.mrb[14].mxu1 }
 0x11a   :  { %v1057_v63 = vmax.f32 %v1025_v57, 0.0  ;;  %v518_v19 = vadd.f32 %v1595_v61, %v1931_v29  ;;  %v512_v2 = vpop.f32.mrb[15].mxu0  ;;  %v1040_v5 = vadd.f32 %v831_v1, %v498_v21  ;;  %v833_v8 = vpop.f32.mrb[15].mxu1 }
 0x11b   :  { %v1049_v4 = vmax.f32 %v1017_v60, 0.0  ;;  %v513_v6 = vadd.f32 %v512_v2, %v1929_v28  ;;  %1516 = vmatmul.mubr.msk.f32.gmra.mrb[34].mxu0 %vm1092_vm3, %v1971_v58 }
 0x11c   :  { %v1041_v7 = vadd.f32 %v833_v8, %v518_v19  ;;  %1317 = vmatprep.mubr.f32.mxu0 %v1712_v0  ;;  %v1072_v9 = vmax.f32 %v1040_v5, 0.0 }
 0x11d   :  { %v1033_v11 = vadd.f32 %v827_v55, %v513_v6  ;;  %v1598_v12 = vpop.f32.mrb[16].mxu0  ;;  %v1628_v29 = vpack.c.bf16 %v1057_v63, %v1049_v4  ;;  %v902_v15 = vpop.f32.mrb[16].mxu1 }
 0x11e   :  { %v1073_v13 = vmax.f32 %v1041_v7, 0.0  ;;  %v522_v14 = vpop.f32.mrb[17].mxu0  ;;  %v1634_v16 = vpack.c.bf16 %v1072_v9, %v1064_v33  ;;  %v904_v28 = vpop.f32.mrb[17].mxu1  ;;  %v528_v30 = vadd.f32 %v1598_v12, %v1947_v10 }
 0x11f   :  { %v1065_v17 = vmax.f32 %v1033_v11, 0.0  ;;  %v523_v18 = vadd.f32 %v522_v14, %v1945_v62  ;;  %1629 = vmatprep.subr.bf16.mxu1 %v1628_v29  ;;  %v252_v12 = vpop.permute.xlu0 %251 }
 0x120   :  { %1631 = vmatpush1.bf16.msra.mxu1 %v1630_v53 }
 0x121   :  { %v1632_v27 = vpack.c.bf16 %v1073_v13, %v1065_v17  ;;  %v1018_v31 = vadd.f32 %v902_v15, %v523_v18  ;;  %v1601_v26 = vpop.f32.mrb[18].mxu0  ;;  %v908_v35 = vpop.f32.mrb[18].mxu1 }
 0x122   :  { %v532_v36 = vpop.f32.mrb[19].mxu0  ;;  %v1026_v38 = vadd.f32 %v908_v35, %v528_v30  ;;  %v910_v41 = vpop.f32.mrb[19].mxu1  ;;  %v538_v53 = vadd.f32 %v1601_v26, %v217_v51 }
 0x123   :  { %v1050_v37 = vmax.f32 %v1018_v31, 0.0  ;;  %v533_v39 = vadd.f32 %v532_v36, %v212_v22  ;;  %1633 = vmatprep.subr.bf16.mxu1 %v1632_v27 }
 0x124   :  { %1635 = vmatpush1.bf16.msra.mxu1 %v1634_v16  ;;  %v1058_v62 = vmax.f32 %v1026_v38, 0.0 }
 0x125   :  { %v1604_v43 = vpop.f32.mrb[20].mxu0  ;;  %v914_v45 = vpop.f32.mrb[20].mxu1 }
 0x126   :  { %v548_v44 = vadd.f32 %v1604_v43, %v1939_v40  ;;  %v542_v47 = vpop.f32.mrb[21].mxu0  ;;  %v1638_v48 = vpack.c.bf16 %v1058_v62, %v1050_v37  ;;  %v1034_v49 = vadd.f32 %v914_v45, %v533_v39  ;;  %v916_v50 = vpop.f32.mrb[21].mxu1 }
 0x127   :  { %v543_v10 = vadd.f32 %v542_v47, %v1937_v34  ;;  %1517 = vmatmul.mubr.msk.f32.vlgmr.msra.gmra.mrb[32].mxu1 %vm1092_vm3, %v1959_v24  ;;  %v257_v39 = vpop.permute.xlu1 %256 }
 0x128   :  { %v1027_v52 = vadd.f32 %v910_v41, %v548_v44  ;;  %1246 = vmatprep.mubr.f32.mxu1 %v1712_v0  ;;  %v1066_v1 = vmax.f32 %v1034_v49, 0.0 }
 0x129   :  { %v1019_v54 = vadd.f32 %v904_v28, %v543_v10  ;;  %v1607_v32 = vpop.f32.mrb[22].mxu0  ;;  %v920_v40 = vpop.f32.mrb[22].mxu1 }
 0x12a   :  { %v1059_v55 = vmax.f32 %v1027_v52, 0.0  ;;  %v558_v57 = vadd.f32 %v1607_v32, %v237_v59  ;;  %v552_v21 = vpop.f32.mrb[23].mxu0  ;;  %v1042_v61 = vadd.f32 %v920_v40, %v538_v53  ;;  %v922_v34 = vpop.f32.mrb[23].mxu1 }
 0x12b   :  { %v1051_v60 = vmax.f32 %v1019_v54, 0.0  ;;  %v553_v63 = vadd.f32 %v552_v21, %v1961_v25  ;;  %1518 = vmatmul.mubr.msk.f32.gmra.mrb[34].mxu1 %vm1092_vm3, %v1971_v58 }
 0x12c   :  { %v1043_v19 = vadd.f32 %v922_v34, %v558_v57  ;;  %1394 = vmatprep.mubr.f32.mxu1 %v1712_v0  ;;  %v1074_v2 = vmax.f32 %v1042_v61, 0.0 }
 0x12d   :  { %v1035_v4 = vadd.f32 %v916_v50, %v553_v63  ;;  %v1610_v5 = vpop.f32.mrb[24].mxu0  ;;  %v1636_v6 = vpack.c.bf16 %v1059_v55, %v1051_v60  ;;  %v991_v7 = vpop.f32.mrb[24].mxu1 }
 0x12e   :  { %v1075_v8 = vmax.f32 %v1043_v19, 0.0  ;;  %v562_v59 = vpop.f32.mrb[25].mxu0  ;;  %v1642_v33 = vpack.c.bf16 %v1074_v2, %v1066_v1  ;;  %v993_v25 = vpop.f32.mrb[25].mxu1  ;;  %v568_v13 = vadd.f32 %v1610_v5, %v1953_v42 }
 0x12f   :  { %v1067_v9 = vmax.f32 %v1035_v4, 0.0  ;;  %v563_v11 = vadd.f32 %v562_v59, %v1949_v23  ;;  %1637 = vmatprep.subr.bf16.mxu0 %v1636_v6  ;;  %v1090_v19 = vpop.permute.xlu1 %1089 }
 0x130   :  { %1639 = vmatpush1.bf16.msra.mxu0 %v1638_v48 }
 0x131   :  { %v1640_v29 = vpack.c.bf16 %v1075_v8, %v1067_v9  ;;  %v1020_v14 = vadd.f32 %v991_v7, %v563_v11  ;;  %v1613_v15 = vpop.f32.mrb[26].mxu0  ;;  %v997_v16 = vpop.f32.mrb[26].mxu1 }
 0x132   :  { %v572_v17 = vpop.f32.mrb[27].mxu0  ;;  %v1028_v28 = vadd.f32 %v997_v16, %v568_v13  ;;  %v999_v27 = vpop.f32.mrb[27].mxu1  ;;  %v578_v62 = vadd.f32 %v1613_v15, %v257_v39 }
 0x133   :  { %v1052_v18 = vmax.f32 %v1020_v14, 0.0  ;;  %v573_v22 = vadd.f32 %v572_v17, %v252_v12  ;;  %1641 = vmatprep.subr.bf16.mxu0 %v1640_v29 }
 0x134   :  { %1643 = vmatpush1.bf16.msra.mxu0 %v1642_v33  ;;  %v1060_v30 = vmax.f32 %v1028_v28, 0.0 }
 0x135   :  { %v1616_v31 = vpop.f32.mrb[28].mxu0  ;;  %v1003_v26 = vpop.f32.mrb[28].mxu1 }
 0x136   :  { %v588_v23 = vadd.f32 %v1616_v31, %v1943_v56  ;;  %v582_v35 = vpop.f32.mrb[29].mxu0  ;;  %v1646_v36 = vpack.c.bf16 %v1060_v30, %v1052_v18  ;;  %v1036_v37 = vadd.f32 %v1003_v26, %v573_v22  ;;  %v1005_v38 = vpop.f32.mrb[29].mxu1 }
 0x137   :  { %v583_v42 = vadd.f32 %v582_v35, %v1941_v46  ;;  %1519 = vmatmul.mubr.msk.f32.vlgmr.msra.gmra.mrb[36].mxu0 %vm1092_vm3, %v1959_v24 }
 0x138   :  { %v1029_v41 = vadd.f32 %v999_v27, %v588_v23  ;;  %1323 = vmatprep.mubr.f32.mxu0 %v1712_v0  ;;  %v1068_v52 = vmax.f32 %v1036_v37, 0.0 }
 0x139   :  { %v1021_v43 = vadd.f32 %v993_v25, %v583_v42  ;;  %v1619_v44 = vpop.f32.mrb[30].mxu0  ;;  %v1009_v47 = vpop.f32.mrb[30].mxu1 }
 0x13a   :  { %v1061_v45 = vmax.f32 %v1029_v41, 0.0  ;;  %v598_v56 = vadd.f32 %v1619_v44, %v1982_v20  ;;  %v592_v48 = vpop.f32.mrb[31].mxu0  ;;  %v1044_v10 = vadd.f32 %v1009_v47, %v578_v62  ;;  %v1011_v50 = vpop.f32.mrb[31].mxu1 }
 0x13b   :  { %v1053_v49 = vmax.f32 %v1021_v43, 0.0  ;;  %v593_v46 = vadd.f32 %v592_v48, %v1975_v3  ;;  %1520 = vmatmul.mubr.msk.f32.gmra.mrb[38].mxu0 %vm1092_vm3, %v1971_v58  ;;  %v1085_v3 = vpop.permute.xlu0 %1084 }
 0x13c   :  { %v1045_v51 = vadd.f32 %v1011_v50, %v598_v56  ;;  %v1076_v53 = vmax.f32 %v1044_v10, 0.0 }
 0x13d   :  { %v1037_v54 = vadd.f32 %v1005_v38, %v593_v46  ;;  %v1644_v32 = vpack.c.bf16 %v1061_v45, %v1053_v49 }
 0x13e   :  { %v1077_v55 = vmax.f32 %v1045_v51, 0.0  ;;  %v1650_v57 = vpack.c.bf16 %v1076_v53, %v1068_v52 }
 0x13f   :  { %v1069_v40 = vmax.f32 %v1037_v54, 0.0  ;;  %1645 = vmatprep.subr.bf16.mxu1 %v1644_v32 }
 0x140   :  { %1647 = vmatpush1.bf16.msra.mxu1 %v1646_v36 }
 0x141   :  { %v1648_v20 = vpack.c.bf16 %v1077_v55, %v1069_v40 }
 0x143   :  { %1649 = vmatprep.subr.bf16.mxu1 %v1648_v20 }
 0x144   :  { %1651 = vmatpush1.bf16.msra.mxu1 %v1650_v57 }
 0x147   :  { %1521 = vmatmul.mubr.msk.f32.vlgmr.msra.gmra.mrb[36].mxu1 %vm1092_vm3, %v1959_v24 }
 0x148   :  { %1400 = vmatprep.mubr.f32.mxu1 %v1712_v0 }
 0x14b   :  { %1522 = vmatmul.mubr.msk.f32.gmra.mrb[38].mxu1 %vm1092_vm3, %v1971_v58 }
 0x1ea   :  { %v1165_v21 = vpop.f32.mrb[32].mxu0 }
 0x1eb   :  { %v1166_v60 = vadd.f32 %v1165_v21, %v1085_v3  ;;  %v1167_v61 = vpop.f32.mrb[33].mxu0 }
 0x1ec   :  { %v1168_v63 = vadd.f32 %v1167_v61, %v1085_v3 }
 0x1ed   :  { %v1407_v34 = vmax.f32 %v1166_v60, 0.0 }
 0x1ee   :  { %v1408_v1 = vmax.f32 %v1168_v63, 0.0  ;;  %v1171_v2 = vpop.f32.mrb[34].mxu0 }
 0x1ef   :  { %1423 = vst [vmem:[%s2065_s7] sm:$0xff] %v1407_v34  ;;  %v1172_v4 = vadd.f32 %v1171_v2, %v1090_v19  ;;  %v1173_v24 = vpop.f32.mrb[35].mxu0 }
 0x1f0   :  { %1523 = vst [vmem:[%s2065_s7 + $0x10] sm:$0xff] %v1408_v1  ;;  %v1174_v0 = vadd.f32 %v1173_v24, %v1090_v19 }
 0x1f1   :  { %v1415_v58 = vmax.f32 %v1172_v4, 0.0 }
 0x1f2   :  { %v1416_v5 = vmax.f32 %v1174_v0, 0.0 }
 0x1f3   :  { %1424 = vst [vmem:[%s2065_s7 + $0x8] sm:$0xff] %v1415_v58 }
 0x1f4   :  { %1524 = vst [vmem:[%s2065_s7 + $0x18] sm:$0xff] %v1416_v5 }
 0x1fa   :  { %v1242_v6 = vpop.f32.mrb[32].mxu1 }
 0x1fb   :  { %v1243_v8 = vadd.f32 %v1242_v6, %v1085_v3  ;;  %v1244_v59 = vpop.f32.mrb[33].mxu1 }
 0x1fc   :  { %v1245_v7 = vadd.f32 %v1244_v59, %v1085_v3 }
 0x1fd   :  { %v1409_v33 = vmax.f32 %v1243_v8, 0.0 }
 0x1fe   :  { %v1410_v9 = vmax.f32 %v1245_v7, 0.0  ;;  %v1248_v11 = vpop.f32.mrb[34].mxu1 }
 0x1ff   :  { %1525 = vst [vmem:[%s2065_s7 + $0x20] sm:$0xff] %v1409_v33  ;;  %v1249_v25 = vadd.f32 %v1248_v11, %v1090_v19  ;;  %v1250_v12 = vpop.f32.mrb[35].mxu1 }
 0x200   :  { %1527 = vst [vmem:[%s2065_s7 + $0x30] sm:$0xff] %v1410_v9  ;;  %v1251_v29 = vadd.f32 %v1250_v12, %v1090_v19 }
 0x201   :  { %v1417_v13 = vmax.f32 %v1249_v25, 0.0 }
 0x202   :  { %v1418_v14 = vmax.f32 %v1251_v29, 0.0 }
 0x203   :  { %1526 = vst [vmem:[%s2065_s7 + $0x28] sm:$0xff] %v1417_v13 }
 0x204   :  { %1528 = vst [vmem:[%s2065_s7 + $0x38] sm:$0xff] %v1418_v14 }
 0x20a   :  { %v1319_v15 = vpop.f32.mrb[36].mxu0 }
 0x20b   :  { %v1320_v16 = vadd.f32 %v1319_v15, %v1085_v3  ;;  %v1321_v17 = vpop.f32.mrb[37].mxu0 }
 0x20c   :  { %v1322_v18 = vadd.f32 %v1321_v17, %v1085_v3 }
 0x20d   :  { %v1411_v28 = vmax.f32 %v1320_v16, 0.0 }
 0x20e   :  { %v1412_v22 = vmax.f32 %v1322_v18, 0.0  ;;  %v1325_v27 = vpop.f32.mrb[38].mxu0 }
 0x20f   :  { %1529 = vst [vmem:[%s2065_s7 + $0x40] sm:$0xff] %v1411_v28  ;;  %v1326_v30 = vadd.f32 %v1325_v27, %v1090_v19  ;;  %v1327_v31 = vpop.f32.mrb[39].mxu0 }
 0x210   :  { %1531 = vst [vmem:[%s2065_s7 + $0x50] sm:$0xff] %v1412_v22  ;;  %v1328_v23 = vadd.f32 %v1327_v31, %v1090_v19 }
 0x211   :  { %v1419_v26 = vmax.f32 %v1326_v30, 0.0 }
 0x212   :  { %v1420_v35 = vmax.f32 %v1328_v23, 0.0 }
 0x213   :  { %1530 = vst [vmem:[%s2065_s7 + $0x48] sm:$0xff] %v1419_v26 }
 0x214   :  { %1532 = vst [vmem:[%s2065_s7 + $0x58] sm:$0xff] %v1420_v35 }
 0x21a   :  { %v1396_v36 = vpop.f32.mrb[36].mxu1 }
 0x21b   :  { %v1397_v37 = vadd.f32 %v1396_v36, %v1085_v3  ;;  %v1398_v42 = vpop.f32.mrb[37].mxu1 }
 0x21c   :  { %v1399_v38 = vadd.f32 %v1398_v42, %v1085_v3 }
 0x21d   :  { %v1413_v39 = vmax.f32 %v1397_v37, 0.0 }
 0x21e   :  { %v1414_v41 = vmax.f32 %v1399_v38, 0.0  ;;  %v1402_v62 = vpop.f32.mrb[38].mxu1 }
 0x21f   :  { %1533 = vst [vmem:[%s2065_s7 + $0x60] sm:$0xff] %v1413_v39  ;;  %v1403_v43 = vadd.f32 %v1402_v62, %v1090_v19  ;;  %v1404_v44 = vpop.f32.mrb[39].mxu1 }
 0x220   :  { %1535 = vst [vmem:[%s2065_s7 + $0x70] sm:$0xff] %v1414_v41  ;;  %v1405_v45 = vadd.f32 %v1404_v44, %v1090_v19 }
 0x221   :  { %v1421_v56 = vmax.f32 %v1403_v43, 0.0 }
 0x222   :  { %v1422_v47 = vmax.f32 %v1405_v45, 0.0 }
 0x223   :  { %1534 = vst [vmem:[%s2065_s7 + $0x68] sm:$0xff] %v1421_v56 }
 0x224   :  { %1536 = vst [vmem:[%s2065_s7 + $0x78] sm:$0xff] %v1422_v47 }
 0x225   :  { %1450 = vsyncpa [#allocation3], 1 }
 0x226   :  { %1451 = vsyncpa [#allocation5], 1 }

</bundles_post_ra>
